<compile_context>
chip_gen: v7x
topology: tpu7x:2x2x1
jax: 0.10.0
libtpu: 0.0.40
codegen_flags: <defaults>
</compile_context>

<pallas_src>
import jax
import jax.numpy as jnp
from jax import lax
from jax.experimental import pallas as pl
from jax.experimental.pallas import tpu as pltpu


_EPS = 1e-5  # nn.InstanceNorm1d default eps


def _pad_amounts(kernel_size: int):
    """PyTorch module's padding_num: 'same' output length for stride-1 conv."""
    if kernel_size % 2 == 1:
        p = (kernel_size - 1) // 2
        return p, p
    return kernel_size // 2, kernel_size // 2 - 1


def _conv1d_dense_matrix(w_oik, seq_len):
    """Fold Conv1d weights + 'same' zero padding into a dense banded matrix.

    w_oik : (C_out, C_in, K) torch-layout weights.
    Returns W of shape (C_in*L, C_out*L) such that, for flat activations
    a[b, i*L + l'] (l' innermost),  (a @ W)[b, o*L + l] == conv1d(a)[b, o, l].
    """
    c_out, c_in, k = w_oik.shape
    pad_l, _ = _pad_amounts(k)
    l_in = jnp.arange(seq_len)[:, None]          # l'
    l_out = jnp.arange(seq_len)[None, :]         # l
    dk = l_in - l_out + pad_l                    # tap index, (L, L)
    valid = (dk >= 0) & (dk < k)
    dk_c = jnp.clip(dk, 0, k - 1)
    band = w_oik[:, :, dk_c] * valid[None, None].astype(w_oik.dtype)  # (Co,Ci,L,L)
    w = jnp.transpose(band, (1, 2, 0, 3)).reshape(c_in * seq_len, c_out * seq_len)
    return w.astype(jnp.float32)


def _segment_mean_matrix(channels, seq_len):
    """Block-diagonal (C*L, C*L) matrix: x @ P = per-(b,c) mean over L, broadcast."""
    return jnp.kron(jnp.eye(channels, dtype=jnp.float32),
                    jnp.ones((seq_len, seq_len), jnp.float32) / float(seq_len))


def _cnn_block_kernel(x_ref, w1_ref, b1_ref, w2_ref, b2_ref,
                      p1_ref, p2_ref, a_ref, o_ref):
    f32 = jnp.float32
    x = x_ref[...].astype(f32)                       # (TB, Cin*L)
    a1 = a_ref[0]                                    # PReLU slopes from SMEM
    a2 = a_ref[1]

    # ---- InstanceNorm1d #1 (mean/var via block-diag averaging matmul; the
    #      stats arrive already broadcast over L so everything stays 2-D).
    mu = jnp.dot(x, p1_ref[...], preferred_element_type=f32)
    c = x - mu
    var = jnp.dot(c * c, p1_ref[...], preferred_element_type=f32)
    xn = c * lax.rsqrt(var + _EPS)                   # (TB, Cin*L)

    # ---- Conv1d #1 ('same' pad folded into the banded matrix) + bias + PReLU
    h = jnp.dot(xn, w1_ref[...], preferred_element_type=f32) + b1_ref[...]
    h = jnp.maximum(h, 0.0) + a1 * jnp.minimum(h, 0.0)

    # ---- InstanceNorm1d #2
    mu = jnp.dot(h, p2_ref[...], preferred_element_type=f32)
    c = h - mu
    var = jnp.dot(c * c, p2_ref[...], preferred_element_type=f32)
    hn = c * lax.rsqrt(var + _EPS)                   # (TB, Cout*L)

    # ---- Conv1d #2 + bias + PReLU
    y = jnp.dot(hn, w2_ref[...], preferred_element_type=f32) + b2_ref[...]
    y = jnp.maximum(y, 0.0) + a2 * jnp.minimum(y, 0.0)

    # ---- Residual: x.repeat(1, C_out//C_in, 1) == tile xn along the fused
    #      channel*L lane axis (no extra channel-major staging buffer).
    rep = o_ref.shape[-1] // x_ref.shape[-1]
    res = xn if rep == 1 else jnp.concatenate([xn] * rep, axis=-1)
    o_ref[...] = (y + res).astype(o_ref.dtype)


def _pick_batch_tile(batch, c_in, c_out, seq_len, itemsize, const_bytes):
    cin_l = c_in * seq_len
    cout_l = c_out * seq_len
    io_row = (cin_l + cout_l) * itemsize                     # HBM bytes / row
    # VMEM per row: double-buffered in/out blocks + ~8 live f32 intermediates.
    vmem_row = 2 * io_row + (8 * cout_l + 2 * cin_l) * 4
    vmem_budget = max((36 << 20) - 2 * const_bytes, 4 << 20)
    bt = min((4 << 20) // max(io_row, 1), vmem_budget // max(vmem_row, 1))
    if batch >= 16:
        # Keep at least two grid steps so the batch can be sharded across the
        # two TensorCores of a v7x chip (no-op on v5e / v6e).
        bt = min(bt, pl.cdiv(batch, 2))
    bt = max(8, (int(bt) // 8) * 8)
    return batch if bt >= batch else bt


def convolution_neural_network(x, params, *, batch_tile=None):
    """x: (B, C_in, L); params from init_params(). Returns (B, C_out, L)."""
    batch, c_in, seq_len = x.shape
    w1, b1 = params["w1"], params["b1"]              # (C_out, C_in, K), (C_out,)
    w2, b2 = params["w2"], params["b2"]
    c_out = w1.shape[0]
    assert c_out % c_in == 0, "residual repeat requires C_out % C_in == 0"

    cin_l = c_in * seq_len
    cout_l = c_out * seq_len
    if cout_l > 1024:
        # TODO(synk): add a streaming K-tap matmul path for large C*L where the
        # dense banded conv matrices (C*L)^2 no longer fit comfortably in VMEM.
        raise NotImplementedError("dense conv-as-matmul path assumes C_out*L <= 1024")

    # Fold conv weights (+ 'same' padding) and instance-norm averaging into
    # small VMEM-resident matrices; fuse biases over the flat channel*L axis.
    w1d = _conv1d_dense_matrix(w1, seq_len)                  # (Cin*L, Cout*L)
    w2d = _conv1d_dense_matrix(w2, seq_len)                  # (Cout*L, Cout*L)
    p1 = _segment_mean_matrix(c_in, seq_len)                 # (Cin*L, Cin*L)
    p2 = _segment_mean_matrix(c_out, seq_len)                # (Cout*L, Cout*L)
    b1r = jnp.repeat(b1.astype(jnp.float32), seq_len)[None, :]   # (1, Cout*L)
    b2r = jnp.repeat(b2.astype(jnp.float32), seq_len)[None, :]
    a_vec = jnp.stack([jnp.asarray(params["a1"], jnp.float32).reshape(()),
                       jnp.asarray(params["a2"], jnp.float32).reshape(())])

    const_bytes = 4 * (w1d.size + w2d.size + p1.size + p2.size + b1r.size + b2r.size)
    if batch_tile is None:
        batch_tile = _pick_batch_tile(batch, c_in, c_out, seq_len,
                                      x.dtype.itemsize, const_bytes)
    tb = int(batch_tile)
    grid = (pl.cdiv(batch, tb),)

    x2d = x.reshape(batch, cin_l)                            # free reshape

    const2 = lambda i: (0, 0)                                # VMEM-resident consts
    out2d = pl.pallas_call(
        _cnn_block_kernel,
        grid=grid,
        in_specs=[
            pl.BlockSpec((tb, cin_l), lambda i: (i, 0)),
            pl.BlockSpec((cin_l, cout_l), const2),
            pl.BlockSpec((1, cout_l), const2),
            pl.BlockSpec((cout_l, cout_l), const2),
            pl.BlockSpec((1, cout_l), const2),
            pl.BlockSpec((cin_l, cin_l), const2),
            pl.BlockSpec((cout_l, cout_l), const2),
            pl.BlockSpec(memory_space=pltpu.MemorySpace.SMEM),
        ],
        out_specs=pl.BlockSpec((tb, cout_l), lambda i: (i, 0)),
        out_shape=jax.ShapeDtypeStruct((batch, cout_l), x.dtype),
        compiler_params=pltpu.CompilerParams(
            dimension_semantics=("parallel",),
            vmem_limit_bytes=48 * 1024 * 1024),
    )(x2d, w1d, b1r, w2d, b2r, p1, p2, a_vec)

    return out2d.reshape(batch, c_out, seq_len)


def init_params(key, input_channels, output_channels, kernel_size):
    """Parameters matching the PyTorch module (torch layouts, default inits)."""
    def conv_init(k, c_in, c_out, ks):
        kw, kb = jax.random.split(k)
        bound = float((c_in * ks) ** -0.5)
        w = jax.random.uniform(kw, (c_out, c_in, ks), jnp.float32, -bound, bound)
        b = jax.random.uniform(kb, (c_out,), jnp.float32, -bound, bound)
        return w, b

    k1, k2 = jax.random.split(key)
    w1, b1 = conv_init(k1, input_channels, output_channels, kernel_size)
    w2, b2 = conv_init(k2, output_channels, output_channels, kernel_size)
    return {
        "w1": w1, "b1": b1, "w2": w2, "b2": b2,
        "a1": jnp.float32(0.25), "a2": jnp.float32(0.25),   # nn.PReLU() default
    }


def reference_forward(x, params):
    """Pure-JAX reference (uses lax.conv) for correctness checking."""
    def inorm(h):
        m = h.mean(-1, keepdims=True)
        v = ((h - m) ** 2).mean(-1, keepdims=True)
        return (h - m) / jnp.sqrt(v + _EPS)

    def prelu(h, a):
        return jnp.maximum(h, 0.0) + a * jnp.minimum(h, 0.0)

    def conv(h, w_oik, b):
        k = w_oik.shape[-1]
        pad_l, pad_r = _pad_amounts(k)
        hp = jnp.pad(h, ((0, 0), (0, 0), (pad_l, pad_r)))
        y = lax.conv_general_dilated(
            hp, w_oik, window_strides=(1,), padding="VALID",
            dimension_numbers=("NCH", "OIH", "NCH"))
        return y + b[None, :, None]

    c_in = x.shape[1]
    c_out = params["w1"].shape[0]
    xn = inorm(x)
    y = prelu(conv(xn, params["w1"], params["b1"]), params["a1"])
    y = inorm(y)
    y = prelu(conv(y, params["w2"], params["b2"]), params["a2"])
    return y + jnp.tile(xn, (1, c_out // c_in, 1))


if __name__ == "__main__":
    key = jax.random.PRNGKey(0)
    kx, kp = jax.random.split(key)

    batch = 2
    input_channels = 4
    output_channels = 8
    kernel_size = 3
    seq_length = 16

    x = jax.random.normal(kx, (batch, input_channels, seq_length), jnp.float32)
    params = init_params(kp, input_channels, output_channels, kernel_size)

    out = jax.block_until_ready(convolution_neural_network(x, params))
    ref = reference_forward(x, params)
    assert out.shape == (batch, output_channels, seq_length), out.shape
    assert jnp.allclose(out, ref, atol=1e-3, rtol=1e-3), \
        float(jnp.max(jnp.abs(out - ref)))

    # Second check: multi-step grid + ragged last batch tile (80 = 32+32+16).
    xb = jax.random.normal(jax.random.PRNGKey(1),
                           (80, input_channels, seq_length), jnp.float32)
    outb = jax.block_until_ready(
        convolution_neural_network(xb, params, batch_tile=32))
    refb = reference_forward(xb, params)
    assert jnp.allclose(outb, refb, atol=1e-3, rtol=1e-3), \
        float(jnp.max(jnp.abs(outb - refb)))

    print("KERNEL_OK")
</pallas_src>

<mosaic_0001>
module attributes {stable_mosaic.version = 11 : i64} {
  func.func @_cnn_block_kernel(%arg0: i32, %arg1: memref<2x64xf32, #tpu.memory_space<vmem>>, %arg2: memref<64x128xf32, #tpu.memory_space<vmem>>, %arg3: memref<1x128xf32, #tpu.memory_space<vmem>>, %arg4: memref<128x128xf32, #tpu.memory_space<vmem>>, %arg5: memref<1x128xf32, #tpu.memory_space<vmem>>, %arg6: memref<64x64xf32, #tpu.memory_space<vmem>>, %arg7: memref<128x128xf32, #tpu.memory_space<vmem>>, %arg8: memref<2xf32, #tpu.memory_space<smem>>, %arg9: memref<2x128xf32, #tpu.memory_space<vmem>>) attributes {dimension_semantics = [#tpu.dimension_semantics<parallel>], iteration_bounds = array<i64: 1>, scalar_prefetch = 0 : i64, scratch_operands = 0 : i64, tpu.core_type = #tpu.core_type<tc>, window_params = [{transform_indices = @transform_0, window_bounds = array<i64: 2, 64>}, {pipeline_mode = #tpu.pipeline_mode<synchronous>, transform_indices = @transform_1, window_bounds = array<i64: 64, 128>}, {pipeline_mode = #tpu.pipeline_mode<synchronous>, transform_indices = @transform_2, window_bounds = array<i64: 1, 128>}, {pipeline_mode = #tpu.pipeline_mode<synchronous>, transform_indices = @transform_3, window_bounds = array<i64: 128, 128>}, {pipeline_mode = #tpu.pipeline_mode<synchronous>, transform_indices = @transform_4, window_bounds = array<i64: 1, 128>}, {pipeline_mode = #tpu.pipeline_mode<synchronous>, transform_indices = @transform_5, window_bounds = array<i64: 64, 64>}, {pipeline_mode = #tpu.pipeline_mode<synchronous>, transform_indices = @transform_6, window_bounds = array<i64: 128, 128>}, {transform_indices = @transform_7, window_bounds = array<i64: 2>}, {transform_indices = @transform_8, window_bounds = array<i64: 2, 128>}]} {
    %c0 = arith.constant 0 : index
    %c0_0 = arith.constant 0 : index
    %0 = vector.load %arg1[%c0, %c0_0] : memref<2x64xf32, #tpu.memory_space<vmem>>, vector<2x64xf32>
    %c0_1 = arith.constant 0 : index
    %1 = memref.load %arg8[%c0_1] : memref<2xf32, #tpu.memory_space<smem>>
    %c1 = arith.constant 1 : index
    %2 = memref.load %arg8[%c1] : memref<2xf32, #tpu.memory_space<smem>>
    %c0_2 = arith.constant 0 : index
    %c0_3 = arith.constant 0 : index
    %3 = vector.load %arg6[%c0_2, %c0_3] : memref<64x64xf32, #tpu.memory_space<vmem>>, vector<64x64xf32>
    %cst = arith.constant dense<0.000000e+00> : vector<2x64xf32>
    %4 = tpu.matmul %0, %3, %cst {dimension_numbers = #tpu.dot_dimension_numbers<[1], [0], [0], [1], [0, 0, 1, 1], [], []>} : vector<2x64xf32>, vector<64x64xf32>, vector<2x64xf32> -> vector<2x64xf32>
    %5 = arith.subf %0, %4 : vector<2x64xf32>
    %6 = arith.mulf %5, %5 : vector<2x64xf32>
    %c0_4 = arith.constant 0 : index
    %c0_5 = arith.constant 0 : index
    %7 = vector.load %arg6[%c0_4, %c0_5] : memref<64x64xf32, #tpu.memory_space<vmem>>, vector<64x64xf32>
    %cst_6 = arith.constant dense<0.000000e+00> : vector<2x64xf32>
    %8 = tpu.matmul %6, %7, %cst_6 {dimension_numbers = #tpu.dot_dimension_numbers<[1], [0], [0], [1], [0, 0, 1, 1], [], []>} : vector<2x64xf32>, vector<64x64xf32>, vector<2x64xf32> -> vector<2x64xf32>
    %cst_7 = arith.constant 9.99999974E-6 : f32
    %9 = vector.broadcast %cst_7 : f32 to vector<2x64xf32>
    %10 = arith.addf %8, %9 : vector<2x64xf32>
    %11 = math.rsqrt %10 : vector<2x64xf32>
    %12 = arith.mulf %5, %11 : vector<2x64xf32>
    %c0_8 = arith.constant 0 : index
    %c0_9 = arith.constant 0 : index
    %13 = vector.load %arg2[%c0_8, %c0_9] : memref<64x128xf32, #tpu.memory_space<vmem>>, vector<64x128xf32>
    %cst_10 = arith.constant dense<0.000000e+00> : vector<2x128xf32>
    %14 = tpu.matmul %12, %13, %cst_10 {dimension_numbers = #tpu.dot_dimension_numbers<[1], [0], [0], [1], [0, 0, 1, 1], [], []>} : vector<2x64xf32>, vector<64x128xf32>, vector<2x128xf32> -> vector<2x128xf32>
    %c0_11 = arith.constant 0 : index
    %c0_12 = arith.constant 0 : index
    %15 = vector.load %arg3[%c0_11, %c0_12] : memref<1x128xf32, #tpu.memory_space<vmem>>, vector<1x128xf32>
    %16 = vector.broadcast %15 : vector<1x128xf32> to vector<2x128xf32>
    %17 = arith.addf %14, %16 : vector<2x128xf32>
    %cst_13 = arith.constant 0.000000e+00 : f32
    %18 = vector.broadcast %cst_13 : f32 to vector<2x128xf32>
    %19 = arith.maximumf %17, %18 : vector<2x128xf32>
    %cst_14 = arith.constant 0.000000e+00 : f32
    %20 = vector.broadcast %cst_14 : f32 to vector<2x128xf32>
    %21 = arith.minimumf %17, %20 : vector<2x128xf32>
    %22 = vector.broadcast %1 : f32 to vector<2x128xf32>
    %23 = arith.mulf %22, %21 : vector<2x128xf32>
    %24 = arith.addf %19, %23 : vector<2x128xf32>
    %c0_15 = arith.constant 0 : index
    %c0_16 = arith.constant 0 : index
    %25 = vector.load %arg7[%c0_15, %c0_16] : memref<128x128xf32, #tpu.memory_space<vmem>>, vector<128x128xf32>
    %cst_17 = arith.constant dense<0.000000e+00> : vector<2x128xf32>
    %26 = tpu.matmul %24, %25, %cst_17 {dimension_numbers = #tpu.dot_dimension_numbers<[1], [0], [0], [1], [0, 0, 1, 1], [], []>} : vector<2x128xf32>, vector<128x128xf32>, vector<2x128xf32> -> vector<2x128xf32>
    %27 = arith.subf %24, %26 : vector<2x128xf32>
    %28 = arith.mulf %27, %27 : vector<2x128xf32>
    %c0_18 = arith.constant 0 : index
    %c0_19 = arith.constant 0 : index
    %29 = vector.load %arg7[%c0_18, %c0_19] : memref<128x128xf32, #tpu.memory_space<vmem>>, vector<128x128xf32>
    %cst_20 = arith.constant dense<0.000000e+00> : vector<2x128xf32>
    %30 = tpu.matmul %28, %29, %cst_20 {dimension_numbers = #tpu.dot_dimension_numbers<[1], [0], [0], [1], [0, 0, 1, 1], [], []>} : vector<2x128xf32>, vector<128x128xf32>, vector<2x128xf32> -> vector<2x128xf32>
    %cst_21 = arith.constant 9.99999974E-6 : f32
    %31 = vector.broadcast %cst_21 : f32 to vector<2x128xf32>
    %32 = arith.addf %30, %31 : vector<2x128xf32>
    %33 = math.rsqrt %32 : vector<2x128xf32>
    %34 = arith.mulf %27, %33 : vector<2x128xf32>
    %c0_22 = arith.constant 0 : index
    %c0_23 = arith.constant 0 : index
    %35 = vector.load %arg4[%c0_22, %c0_23] : memref<128x128xf32, #tpu.memory_space<vmem>>, vector<128x128xf32>
    %cst_24 = arith.constant dense<0.000000e+00> : vector<2x128xf32>
    %36 = tpu.matmul %34, %35, %cst_24 {dimension_numbers = #tpu.dot_dimension_numbers<[1], [0], [0], [1], [0, 0, 1, 1], [], []>} : vector<2x128xf32>, vector<128x128xf32>, vector<2x128xf32> -> vector<2x128xf32>
    %c0_25 = arith.constant 0 : index
    %c0_26 = arith.constant 0 : index
    %37 = vector.load %arg5[%c0_25, %c0_26] : memref<1x128xf32, #tpu.memory_space<vmem>>, vector<1x128xf32>
    %38 = vector.broadcast %37 : vector<1x128xf32> to vector<2x128xf32>
    %39 = arith.addf %36, %38 : vector<2x128xf32>
    %cst_27 = arith.constant 0.000000e+00 : f32
    %40 = vector.broadcast %cst_27 : f32 to vector<2x128xf32>
    %41 = arith.maximumf %39, %40 : vector<2x128xf32>
    %cst_28 = arith.constant 0.000000e+00 : f32
    %42 = vector.broadcast %cst_28 : f32 to vector<2x128xf32>
    %43 = arith.minimumf %39, %42 : vector<2x128xf32>
    %44 = vector.broadcast %2 : f32 to vector<2x128xf32>
    %45 = arith.mulf %44, %43 : vector<2x128xf32>
    %46 = arith.addf %41, %45 : vector<2x128xf32>
    %47 = tpu.concatenate %12, %12 in 1 : vector<2x64xf32>, vector<2x64xf32> -> vector<2x128xf32>
    %48 = arith.addf %46, %47 : vector<2x128xf32>
    %c0_29 = arith.constant 0 : index
    %c0_30 = arith.constant 0 : index
    %49 = vector.load %arg9[%c0_29, %c0_30] : memref<2x128xf32, #tpu.memory_space<vmem>>, vector<2x128xf32>
    tpu.vector_store %arg9[%c0_29, %c0_30], %48 {strides = array<i32>} : memref<2x128xf32, #tpu.memory_space<vmem>>, vector<2x128xf32>,
    return
  }
  func.func @transform_0(%arg0: i32) -> (i32, i32) {
    %c0_i32 = arith.constant 0 : i32
    %c0_i32_0 = arith.constant 0 : i32
    return %arg0, %c0_i32 : i32, i32
  }
  func.func @transform_1(%arg0: i32) -> (i32, i32) {
    %c0_i32 = arith.constant 0 : i32
    %c0_i32_0 = arith.constant 0 : i32
    %c0_i32_1 = arith.constant 0 : i32
    return %c0_i32, %c0_i32_0 : i32, i32
  }
  func.func @transform_2(%arg0: i32) -> (i32, i32) {
    %c0_i32 = arith.constant 0 : i32
    %c0_i32_0 = arith.constant 0 : i32
    %c0_i32_1 = arith.constant 0 : i32
    return %c0_i32, %c0_i32_0 : i32, i32
  }
  func.func @transform_3(%arg0: i32) -> (i32, i32) {
    %c0_i32 = arith.constant 0 : i32
    %c0_i32_0 = arith.constant 0 : i32
    %c0_i32_1 = arith.constant 0 : i32
    return %c0_i32, %c0_i32_0 : i32, i32
  }
  func.func @transform_4(%arg0: i32) -> (i32, i32) {
    %c0_i32 = arith.constant 0 : i32
    %c0_i32_0 = arith.constant 0 : i32
    %c0_i32_1 = arith.constant 0 : i32
    return %c0_i32, %c0_i32_0 : i32, i32
  }
  func.func @transform_5(%arg0: i32) -> (i32, i32) {
    %c0_i32 = arith.constant 0 : i32
    %c0_i32_0 = arith.constant 0 : i32
    %c0_i32_1 = arith.constant 0 : i32
    return %c0_i32, %c0_i32_0 : i32, i32
  }
  func.func @transform_6(%arg0: i32) -> (i32, i32) {
    %c0_i32 = arith.constant 0 : i32
    %c0_i32_0 = arith.constant 0 : i32
    %c0_i32_1 = arith.constant 0 : i32
    return %c0_i32, %c0_i32_0 : i32, i32
  }
  func.func @transform_7(%arg0: i32) -> i32 {
    %c0_i32 = arith.constant 0 : i32
    %c0_i32_0 = arith.constant 0 : i32
    return %c0_i32 : i32
  }
  func.func @transform_8(%arg0: i32) -> (i32, i32) {
    %c0_i32 = arith.constant 0 : i32
    %c0_i32_0 = arith.constant 0 : i32
    return %arg0, %c0_i32 : i32, i32
  }
}

</mosaic_0001>

<bundles_post_ra>
// kernel: tpu_custom_call.1
= control target key start
LH: loop header
LB: loop body
LE: loop exit
PB: predicated region body
PF: predicated region fallthrough
CT: control target
= control target key end

     0   :  { %13 = vsyncpa [#allocation3], 0  ;;  %s1379_s0 = inlined_call_operand.hbm [shape: f32[2,64], index: 0, kind: input, shape index: {}]   ;;  %s1380_s1 = inlined_call_operand.hbm [shape: f32[64,128], index: 1, kind: input, shape index: {}]   ;;  %s1381_s2 = inlined_call_operand.vmem [shape: f32[1,128], index: 2, kind: input, shape index: {}]   ;;  %s1382_s3 = inlined_call_operand.hbm [shape: f32[128,128], index: 3, kind: input, shape index: {}]   ;;  %s1383_s4 = inlined_call_operand.vmem [shape: f32[1,128], index: 4, kind: input, shape index: {}]   ;;  %s1384_s5 = inlined_call_operand.hbm [shape: f32[64,64], index: 5, kind: input, shape index: {}]   ;;  %s1385_s6 = inlined_call_operand.hbm [shape: f32[128,128], index: 6, kind: input, shape index: {}]   ;;  %s1386_s7 = inlined_call_operand.vmem [shape: f32[2], index: 7, kind: input, shape index: {}]   ;;  %s1387_s8 = inlined_call_operand.hbm [shape: f32[2,128], index: 8, kind: output, shape index: {}]  }
   0x1   :  { %14 = vsyncpa [#allocation7], 0 }
   0x2   :  { %15 = vsyncpa [#allocation10], 0 }
   0x3   :  { %16 = vsyncpa [#allocation5], 0 }
   0x4   :  { %17 = vsyncpa [#allocation4], 0  ;;  %s1171_s27 = smov [#allocation6]   ;;  %s1017_s9 = scalar_lea.hbm %s1380_s1, 1024 }
   0x5   :  { %s33_s28 = sshll.u32 %s1171_s27, 4  ;;  %p1018_p0 = scmp.ne.s32.totalorder %s1380_s1, %s1017_s9  ;;  %s34_s28 = int_to_ptr.vmem [resolvable:$true] %s33_s28 }
   0x6   :  { %p1021_p1 = scmp.lt.u32.totalorder %s1017_s9, %s1380_s1 }
   0x8   :  { %p1023_p2 = pnand %p1021_p1, %p1018_p0 }
   0xa   :  { %1026 = shalt.err (!%p1023_p2)
}
   0xb   :  { %s1027_s14 = scalar_lea.vmem %s34_s28, 1024  ;;  %p1032_p4 = scmp.lt.s32.totalorder %s34_s28, %s34_s28 }
   0xc   :  { %p1028_p3 = scmp.ne.s32.totalorder %s34_s28, %s1027_s14  ;;  %p1033_p5 = scmp.lt.s32.totalorder %s1027_s14, %s1027_s14 }
   0xe   :  { %p1034_p6 = por %p1033_p5, %p1032_p4 }
  0x10   :  { %p1035_p7 = pnand %p1034_p6, %p1028_p3 }
  0x12   :  { %1038 = shalt.err (!%p1035_p7)
}
  0x13   :  { %s1172_s15 = smov 128   ;;  %s1173_s16 = smov 8  }
  0x14   :  { %39 = dma.hbm_to_vmem [thread:$0]  %s1380_s1, 1024, %s34_s28, [#allocation7], %s1172_s15, %s1172_s15, %s1173_s16  }
  0x15   :  { %s1174_s19 = smov [#allocation9]   ;;  %s1175_s21 = smov [#allocation2]  }
  0x16   :  { %s61_s20 = sshll.u32 %s1174_s19, 4  ;;  %s24_s22 = sshll.u32 %s1175_s21, 4  ;;  %s62_s20 = int_to_ptr.vmem [resolvable:$true] %s61_s20  ;;  %s25_s22 = int_to_ptr.vmem [resolvable:$true] %s24_s22 }
  0x17   :  { %s1039_s25 = scalar_lea.hbm %s1384_s5, 1024 }
  0x18   :  { %p1040_p8 = scmp.ne.s32.totalorder %s1384_s5, %s1039_s25  ;;  %p1043_p9 = scmp.lt.u32.totalorder %s1039_s25, %s1384_s5 }
  0x1a   :  { %p1045_p10 = pnand %p1043_p9, %p1040_p8 }
  0x1c   :  { %1048 = shalt.err (!%p1045_p10)
}
  0x1d   :  { %s1049_s1 = scalar_lea.vmem %s62_s20, 1024  ;;  %p1054_p12 = scmp.lt.s32.totalorder %s62_s20, %s62_s20 }
  0x1e   :  { %p1050_p11 = scmp.ne.s32.totalorder %s62_s20, %s1049_s1  ;;  %p1055_p13 = scmp.lt.s32.totalorder %s1049_s1, %s1049_s1 }
  0x20   :  { %p1056_p0 = por %p1055_p13, %p1054_p12 }
  0x22   :  { %p1057_p1 = pnand %p1056_p0, %p1050_p11 }
  0x24   :  { %1060 = shalt.err (!%p1057_p1)
}
  0x25   :  { %67 = dma.hbm_to_vmem [thread:$0]  %s1384_s5, 1024, %s62_s20, [#allocation10], %s1172_s15, %s1172_s15, %s1173_s16  }
  0x26   :  { %s1061_s12 = scalar_lea.hbm %s1379_s0, 32 }
  0x27   :  { %p1062_p2 = scmp.ne.s32.totalorder %s1379_s0, %s1061_s12  ;;  %p1065_p3 = scmp.lt.u32.totalorder %s1061_s12, %s1379_s0 }
  0x29   :  { %p1067_p4 = pnand %p1065_p3, %p1062_p2 }
  0x2b   :  { %1070 = shalt.err (!%p1067_p4)
}
  0x2c   :  { %s1071_s19 = scalar_lea.vmem %s25_s22, 32  ;;  %p1076_p6 = scmp.lt.s32.totalorder %s25_s22, %s25_s22 }
  0x2d   :  { %p1072_p5 = scmp.ne.s32.totalorder %s25_s22, %s1071_s19  ;;  %p1077_p7 = scmp.lt.s32.totalorder %s1071_s19, %s1071_s19 }
  0x2f   :  { %p1078_p8 = por %p1077_p7, %p1076_p6 }
  0x31   :  { %p1079_p9 = pnand %p1078_p8, %p1072_p5 }
  0x33   :  { %1082 = shalt.err (!%p1079_p9)
}
  0x34   :  { %27 = dma.hbm_to_vmem [thread:$0]  %s1379_s0, 32, %s25_s22, [#allocation3]  }
  0x35   :  { %s1176_s21 = smov [#allocation8]   ;;  %s1177_s24 = smov [#allocation11]  }
  0x36   :  { %s47_s23 = sshll.u32 %s1176_s21, 4  ;;  %s73_s25 = sshll.u32 %s1177_s24, 4  ;;  %s48_s23 = int_to_ptr.vmem [resolvable:$true] %s47_s23  ;;  %s74_s25 = int_to_ptr.vmem [resolvable:$true] %s73_s25 }
  0x37   :  { %s1083_s29 = scalar_lea.hbm %s1382_s3, 2048 }
  0x38   :  { %p1084_p10 = scmp.ne.s32.totalorder %s1382_s3, %s1083_s29  ;;  %p1087_p11 = scmp.lt.u32.totalorder %s1083_s29, %s1382_s3 }
  0x3a   :  { %p1089_p12 = pnand %p1087_p11, %p1084_p10 }
  0x3c   :  { %1092 = shalt.err (!%p1089_p12)
}
  0x3d   :  { %s1093_s0 = scalar_lea.vmem %s48_s23, 2048  ;;  %p1098_p0 = scmp.lt.s32.totalorder %s48_s23, %s48_s23 }
  0x3e   :  { %p1094_p13 = scmp.ne.s32.totalorder %s48_s23, %s1093_s0  ;;  %p1099_p1 = scmp.lt.s32.totalorder %s1093_s0, %s1093_s0 }
  0x40   :  { %p1100_p2 = por %p1099_p1, %p1098_p0 }
  0x42   :  { %p1101_p3 = pnand %p1100_p2, %p1094_p13 }
  0x44   :  { %1104 = shalt.err (!%p1101_p3)
}
  0x45   :  { %53 = dma.hbm_to_vmem [thread:$0]  %s1382_s3, 2048, %s48_s23, [#allocation7], %s1172_s15, %s1172_s15, %s1173_s16  }
  0x46   :  { %s86_s13 = sshll.u32 %s1386_s7, 4  ;;  %s1105_s18 = scalar_lea.hbm %s1385_s6, 2048  ;;  %s87_s13 = int_to_ptr.vmem [resolvable:$true] %s86_s13 }
  0x47   :  { %p1106_p4 = scmp.ne.s32.totalorder %s1385_s6, %s1105_s18  ;;  %p1109_p5 = scmp.lt.u32.totalorder %s1105_s18, %s1385_s6 }
  0x49   :  { %p1111_p6 = pnand %p1109_p5, %p1106_p4 }
  0x4b   :  { %1114 = shalt.err (!%p1111_p6)
}
  0x4c   :  { %s1115_s3 = scalar_lea.vmem %s74_s25, 2048  ;;  %p1120_p8 = scmp.lt.s32.totalorder %s74_s25, %s74_s25 }
  0x4d   :  { %p1116_p7 = scmp.ne.s32.totalorder %s74_s25, %s1115_s3  ;;  %p1121_p9 = scmp.lt.s32.totalorder %s1115_s3, %s1115_s3 }
  0x4f   :  { %p1122_p10 = por %p1121_p9, %p1120_p8 }
  0x51   :  { %p1123_p11 = pnand %p1122_p10, %p1116_p7 }
  0x53   :  { %1126 = shalt.err (!%p1123_p11)
}
  0x54   :  { %79 = dma.hbm_to_vmem [thread:$0]  %s1385_s6, 2048, %s74_s25, [#allocation10], %s1172_s15, %s1172_s15, %s1173_s16  }
  0x55   :  { %s1127_s24 = scalar_lea.vmem %s87_s13, 16  ;;  %p1132_p13 = scmp.lt.s32.totalorder %s87_s13, %s87_s13 }
  0x56   :  { %p1128_p12 = scmp.ne.s32.totalorder %s87_s13, %s1127_s24  ;;  %p1133_p0 = scmp.lt.s32.totalorder %s1127_s24, %s1127_s24 }
  0x58   :  { %p1134_p1 = por %p1133_p0, %p1132_p13 }
  0x5a   :  { %p1135_p2 = pnand %p1134_p1, %p1128_p12 }
  0x5c   :  { %1138 = shalt.err (!%p1135_p2)
}
  0x5d   :  { %s1178_s26 = smov [#allocation12]  }
  0x5e   :  { %89 = dma.vmem_to_smem %s87_s13, 16, %s1178_s26, [#allocation5]  }
  0x5f   :  { %1161 = dma.done.wait [#allocation3], 32  }
  0x60   :  { %1162 = vsyncadd [#allocation3], 4294967264 }
  0x61   :  { %1163 = dma.done.wait [#allocation7], 3072  }
  0x62   :  { %1164 = vsyncadd [#allocation7], 4294964224 }
  0x63   :  { %1165 = dma.done.wait [#allocation10], 3072  }
  0x64   :  { %1166 = vsyncadd [#allocation10], 4294964224 }
  0x65   :  { %1167 = dma.done.wait [#allocation5], 16  }
  0x66   :  { %1168 = vsyncadd [#allocation5], 4294967280 }
  0x67   :  { %108 = sfence }
  0x68   :  { %v112_v0 = vld [vmem:[#allocation9] sm:$0xff]  ;;  %v113_v1 = vld [vmem:[#allocation9 + $0x8] sm:$0xff]  ;;  %v114_v2 = vld [vmem:[#allocation9 + $0x10] sm:$0xff]  ;;  %v1179_v3 = vmov 0.0|0.0   ;;  %vm1180_vm0 = vmmov 0   ;;  %v1181_v6 = vmov 0.0  }
  0x69   :  { %892 = vmatprep.subr.bf16.mxu0 %v1179_v3  ;;  %v893_v4 = vpack.c.bf16 %v113_v1, %v112_v0  ;;  %v115_v5 = vld [vmem:[#allocation9 + $0x18] sm:$0xff]  ;;  %746 = vmatprep.mubr.msk.f32.mxu0 %vm1180_vm0, %v1181_v6  ;;  %v116_v8 = vld [vmem:[#allocation9 + $0x20] sm:$0xff]  ;;  %v117_v9 = vld [vmem:[#allocation9 + $0x28] sm:$0xff]  ;;  %vm120_vm1 = vcmask 523264   ;;  %s1182_s6 = smov 64   ;;  %s110_s15 = sld [smem:[#allocation12]] }
  0x6a   :  { %904 = vmatprep.subr.bf16.mxu1 %v1179_v3  ;;  %765 = vmatprep.mubr.msk.f32.mxu1 %vm1180_vm0, %v1181_v6  ;;  %v896_v7 = vpack.c.bf16 %v115_v5, %v114_v2  ;;  %v899_v10 = vpack.c.bf16 %v117_v9, %v116_v8  ;;  %v118_v11 = vld [vmem:[#allocation9 + $0x30] sm:$0xff]  ;;  %v119_v12 = vld [vmem:[#allocation9 + $0x38] sm:$0xff]  ;;  %v271_v19 = vld [vmem:[#allocation6] sm:$0xff]  ;;  %s1183_s30 = smov [#allocation13]  }
  0x6b   :  { %894 = vmatpush3.bf16.msra.mxu0 %v893_v4  ;;  %906 = vmatpush3.bf16.msra.mxu1 %v893_v4  ;;  %v902_v13 = vpack.c.bf16 %v119_v12, %v118_v11  ;;  %v109_v14 = vld [vmem:[#allocation2] sm:$0x3]  ;;  %v272_v20 = vld [vmem:[#allocation6 + $0x8] sm:$0xff]  ;;  %v273_v22 = vld [vmem:[#allocation6 + $0x10] sm:$0xff]  ;;  %s634_s1 = sshll.u32 %s1183_s30, 4  ;;  %s635_s1 = int_to_ptr.vmem [resolvable:$true] %s634_s1 }
  0x6c   :  { %895 = vmatprep.subr.bf16.mxu0 %v1179_v3  ;;  %907 = vmatprep.subr.bf16.mxu1 %v1179_v3  ;;  %v917_v21 = vpack.c.bf16 %v272_v20, %v271_v19  ;;  %v274_v23 = vld [vmem:[#allocation6 + $0x18] sm:$0xff]  ;;  %v275_v25 = vld [vmem:[#allocation6 + $0x20] sm:$0xff]  ;;  %v276_v26 = vld [vmem:[#allocation6 + $0x28] sm:$0xff]  ;;  %s1139_s28 = scalar_lea.vmem %s635_s1, 32  ;;  %p1144_p4 = scmp.lt.s32.totalorder %s635_s1, %s635_s1 }
  0x6d   :  { %v920_v24 = vpack.c.bf16 %v274_v23, %v273_v22  ;;  %v923_v27 = vpack.c.bf16 %v276_v26, %v275_v25  ;;  %v277_v28 = vld [vmem:[#allocation6 + $0x30] sm:$0xff]  ;;  %v278_v29 = vld [vmem:[#allocation6 + $0x38] sm:$0xff]  ;;  %v364_v34 = vld [vmem:[#allocation11] sm:$0xff]  ;;  %p1140_p3 = scmp.ne.s32.totalorder %s635_s1, %s1139_s28  ;;  %p1145_p5 = scmp.lt.s32.totalorder %s1139_s28, %s1139_s28 }
  0x6e   :  { %v926_v30 = vpack.c.bf16 %v278_v29, %v277_v28  ;;  %v365_v35 = vld [vmem:[#allocation11 + $0x8] sm:$0xff]  ;;  %v366_v36 = vld [vmem:[#allocation11 + $0x10] sm:$0xff]  ;;  %v367_v38 = vld [vmem:[#allocation11 + $0x18] sm:$0xff] }
  0x6f   :  { %897 = vmatpush3.bf16.msra.mxu0 %v896_v7  ;;  %909 = vmatpush3.bf16.msra.mxu1 %v896_v7  ;;  %v929_v37 = vpack.c.bf16 %v365_v35, %v364_v34  ;;  %v932_v39 = vpack.c.bf16 %v367_v38, %v366_v36  ;;  %v368_v40 = vld [vmem:[#allocation11 + $0x20] sm:$0xff]  ;;  %v369_v41 = vld [vmem:[#allocation11 + $0x28] sm:$0xff]  ;;  %v370_v43 = vld [vmem:[#allocation11 + $0x30] sm:$0xff]  ;;  %v361_v0 = vstv %s110_s15  ;;  %p1146_p6 = por %p1145_p5, %p1144_p4 }
  0x70   :  { %898 = vmatprep.subr.bf16.mxu0 %v1179_v3  ;;  %910 = vmatprep.subr.bf16.mxu1 %v1179_v3  ;;  %v935_v42 = vpack.c.bf16 %v369_v41, %v368_v40  ;;  %v371_v44 = vld [vmem:[#allocation11 + $0x38] sm:$0xff]  ;;  %v372_v48 = vld [vmem:[#allocation11 + $0x40] sm:$0xff]  ;;  %v373_v49 = vld [vmem:[#allocation11 + $0x48] sm:$0xff] }
  0x71   :  { %v938_v47 = vpack.c.bf16 %v371_v44, %v370_v43  ;;  %v941_v50 = vpack.c.bf16 %v373_v49, %v372_v48  ;;  %v374_v51 = vld [vmem:[#allocation11 + $0x50] sm:$0xff]  ;;  %v375_v52 = vld [vmem:[#allocation11 + $0x58] sm:$0xff]  ;;  %v376_v54 = vld [vmem:[#allocation11 + $0x60] sm:$0xff]  ;;  %p1147_p7 = pnand %p1146_p6, %p1140_p3 }
  0x72   :  { %v944_v53 = vpack.c.bf16 %v375_v52, %v374_v51  ;;  %v377_v55 = vld [vmem:[#allocation11 + $0x68] sm:$0xff]  ;;  %v378_v57 = vld [vmem:[#allocation11 + $0x70] sm:$0xff]  ;;  %v379_v58 = vld [vmem:[#allocation11 + $0x78] sm:$0xff] }
  0x73   :  { %900 = vmatpush3.bf16.msra.mxu0 %v899_v10  ;;  %912 = vmatpush3.bf16.msra.mxu1 %v899_v10  ;;  %v947_v56 = vpack.c.bf16 %v377_v55, %v376_v54  ;;  %v950_v59 = vpack.c.bf16 %v379_v58, %v378_v57  ;;  %v649_v60 = vld [vmem:[%s1381_s2] ss:$0 sm:$0xff]  ;;  %v524_v7 = vld [vmem:[#allocation8] sm:$0xff]  ;;  %v525_v8 = vld [vmem:[#allocation8 + $0x8] sm:$0xff]  ;;  %s646_s2 = sld [smem:[#allocation12 + $0x1]] }
  0x74   :  { %901 = vmatprep.subr.bf16.mxu0 %v1179_v3  ;;  %913 = vmatprep.subr.bf16.mxu1 %v1179_v3  ;;  %v526_v9 = vld [vmem:[#allocation8 + $0x10] sm:$0xff]  ;;  %v977_v10 = vpack.c.bf16 %v525_v8, %v524_v7  ;;  %v527_v11 = vld [vmem:[#allocation8 + $0x18] sm:$0xff]  ;;  %v532_v22 = vld [vmem:[#allocation8 + $0x40] sm:$0xff] }
  0x75   :  { %v980_v12 = vpack.c.bf16 %v527_v11, %v526_v9  ;;  %v533_v23 = vld [vmem:[#allocation8 + $0x48] sm:$0xff]  ;;  %v534_v25 = vld [vmem:[#allocation8 + $0x50] sm:$0xff]  ;;  %v535_v26 = vld [vmem:[#allocation8 + $0x58] sm:$0xff] }
  0x76   :  { %v536_v28 = vld [vmem:[#allocation8 + $0x60] sm:$0xff]  ;;  %v537_v29 = vld [vmem:[#allocation8 + $0x68] sm:$0xff] }
  0x77   :  { %903 = vmatpush3.bf16.msra.mxu0 %v902_v13  ;;  %915 = vmatpush3.bf16.msra.mxu1 %v902_v13  ;;  %v528_v13 = vld [vmem:[#allocation8 + $0x20] sm:$0xff] }
  0x78   :  { %916 = vmatprep.subr.bf16.mxu0 %v1179_v3  ;;  %928 = vmatprep.subr.bf16.mxu1 %v1179_v3 }
  0x79   :  { %v619_v43 = vstv %s646_s2 }
  0x7a   :  { %747 = vmatmul.mubr.msk.f32.vlgmr.msra.gmra.mrb[0].mxu0 %vm120_vm1, %v109_v14 }
  0x7b   :  { %784 = vmatprep.mubr.msk.f32.mxu0 %vm1180_vm0, %v1181_v6  ;;  %918 = vmatpush3.bf16.msra.mxu0 %v917_v21 }
  0x7c   :  { %919 = vmatprep.subr.bf16.mxu0 %v1179_v3 }
  0x7f   :  { %921 = vmatpush3.bf16.msra.mxu0 %v920_v24  ;;  %v989_v24 = vpack.c.bf16 %v533_v23, %v532_v22 }
  0x80   :  { %922 = vmatprep.subr.bf16.mxu0 %v1179_v3 }
  0x83   :  { %924 = vmatpush3.bf16.msra.mxu0 %v923_v27  ;;  %v992_v27 = vpack.c.bf16 %v535_v26, %v534_v25 }
  0x84   :  { %925 = vmatprep.subr.bf16.mxu0 %v1179_v3 }
  0x87   :  { %927 = vmatpush3.bf16.msra.mxu0 %v926_v30  ;;  %v995_v30 = vpack.c.bf16 %v537_v29, %v536_v28 }
  0x88   :  { %952 = vmatprep.subr.bf16.mxu0 %v1179_v3 }
 0x14d   :  { %v190_v15 = vpop.f32.mrb[0].mxu0 }
 0x14e   :  { %v194_v16 = vsub.f32 %v109_v14, %v190_v15  ;;  %v748_v17 = vpop.f32.mrb[1].mxu0  ;;  %v529_v14 = vld [vmem:[#allocation8 + $0x28] sm:$0xff] }
 0x14f   :  { %v983_v15 = vpack.c.bf16 %v529_v14, %v528_v13  ;;  %v531_v17 = vld [vmem:[#allocation8 + $0x38] sm:$0xff] }
 0x150   :  { %v195_v18 = vmul.f32 %v194_v16, %v194_v16 }
 0x152   :  { %766 = vmatmul.mubr.msk.f32.vlgmr.msra.gmra.mrb[0].mxu1 %vm120_vm1, %v195_v18 }
 0x153   :  { %819 = vmatprep.mubr.msk.f32.mxu1 %vm1180_vm0, %v1181_v6  ;;  %930 = vmatpush3.bf16.msra.mxu1 %v929_v37 }
 0x154   :  { %931 = vmatprep.subr.bf16.mxu1 %v1179_v3 }
 0x157   :  { %933 = vmatpush3.bf16.msra.mxu1 %v932_v39 }
 0x158   :  { %934 = vmatprep.subr.bf16.mxu1 %v1179_v3 }
 0x15b   :  { %936 = vmatpush3.bf16.msra.mxu1 %v935_v42 }
 0x15c   :  { %937 = vmatprep.subr.bf16.mxu1 %v1179_v3 }
 0x15f   :  { %939 = vmatpush3.bf16.msra.mxu1 %v938_v47 }
 0x160   :  { %940 = vmatprep.subr.bf16.mxu1 %v1179_v3 }
 0x163   :  { %942 = vmatpush3.bf16.msra.mxu1 %v941_v50 }
 0x164   :  { %943 = vmatprep.subr.bf16.mxu1 %v1179_v3 }
 0x167   :  { %945 = vmatpush3.bf16.msra.mxu1 %v944_v53 }
 0x168   :  { %946 = vmatprep.subr.bf16.mxu1 %v1179_v3 }
 0x16b   :  { %948 = vmatpush3.bf16.msra.mxu1 %v947_v56 }
 0x16c   :  { %949 = vmatprep.subr.bf16.mxu1 %v1179_v3 }
 0x16f   :  { %951 = vmatpush3.bf16.msra.mxu1 %v950_v59 }
 0x170   :  { %976 = vmatprep.subr.bf16.mxu1 %v1179_v3 }
 0x225   :  { %v265_v31 = vpop.f32.mrb[0].mxu1 }
 0x226   :  { %v266_v32 = vadd.f32 1e-05, %v265_v31  ;;  %v767_v33 = vpop.f32.mrb[1].mxu1  ;;  %v538_v31 = vld [vmem:[#allocation8 + $0x70] sm:$0xff] }
 0x228   :  { %1013 = vrsqrt.f32 %v266_v32  ;;  %v539_v32 = vld [vmem:[#allocation8 + $0x78] sm:$0xff] }
 0x229   :  { %v998_v33 = vpack.c.bf16 %v539_v32, %v538_v31 }
 0x232   :  { %v1014_v45 = vpop.eup %1013 }
 0x233   :  { %v1330_v46 = vmul.f32 %v1014_v45, %v194_v16  ;;  %v530_v16 = vld [vmem:[#allocation8 + $0x30] sm:$0xff] }
 0x234   :  { %v986_v18 = vpack.c.bf16 %v531_v17, %v530_v16 }
 0x235   :  { %785 = vmatmul.mubr.msk.f32.vlgmr.msra.gmra.mrb[2].mxu0 %vm120_vm1, %v1330_v46  ;;  %622 = vrot.lane.b32.xlu0 %v1330_v46, %s1182_s6 }
 0x236   :  { %954 = vmatpush3.bf16.msra.mxu0 %v929_v37  ;;  %854 = vmatprep.mubr.msk.f32.mxu0 %vm1180_vm0, %v1181_v6 }
 0x237   :  { %955 = vmatprep.subr.bf16.mxu0 %v1179_v3 }
 0x23a   :  { %957 = vmatpush3.bf16.msra.mxu0 %v932_v39  ;;  %v651_v39 = vld [vmem:[%s1383_s4] ss:$0 sm:$0xff] }
 0x23b   :  { %958 = vmatprep.subr.bf16.mxu0 %v1179_v3 }
 0x23e   :  { %960 = vmatpush3.bf16.msra.mxu0 %v935_v42 }
 0x23f   :  { %961 = vmatprep.subr.bf16.mxu0 %v1179_v3 }
 0x242   :  { %963 = vmatpush3.bf16.msra.mxu0 %v938_v47 }
 0x243   :  { %964 = vmatprep.subr.bf16.mxu0 %v1179_v3 }
 0x246   :  { %966 = vmatpush3.bf16.msra.mxu0 %v941_v50 }
 0x247   :  { %967 = vmatprep.subr.bf16.mxu0 %v1179_v3 }
 0x24a   :  { %969 = vmatpush3.bf16.msra.mxu0 %v944_v53 }
 0x24b   :  { %970 = vmatprep.subr.bf16.mxu0 %v1179_v3 }
 0x24e   :  { %972 = vmatpush3.bf16.msra.mxu0 %v947_v56 }
 0x24f   :  { %973 = vmatprep.subr.bf16.mxu0 %v1179_v3 }
 0x252   :  { %975 = vmatpush3.bf16.msra.mxu0 %v950_v59 }
 0x2a7   :  { %v623_v45 = vpop.permute.xlu0 %622 }
 0x2a8   :  { %v625_v49 = vsel %vm120_vm1, %v1330_v46, %v623_v45 }
 0x308   :  { %v355_v61 = vpop.f32.mrb[2].mxu0 }
 0x309   :  { %v356_v62 = vadd.f32 %v649_v60, %v355_v61  ;;  %v786_v63 = vpop.f32.mrb[3].mxu0 }
 0x30b   :  { %v360_v1 = vmin.f32 %v356_v62, 0.0  ;;  %v359_v2 = vmax.f32 %v356_v62, 0.0 }
 0x30d   :  { %v362_v4 = vmul.f32 %v361_v0, %v360_v1 }
 0x30f   :  { %v363_v5 = vadd.f32 %v362_v4, %v359_v2 }
 0x311   :  { %820 = vmatmul.mubr.f32.vlgmr.msra.gmra.mrb[2].mxu1 %v363_v5 }
 0x312   :  { %889 = vmatprep.mubr.msk.f32.mxu1 %vm1180_vm0, %v1181_v6  ;;  %978 = vmatpush3.bf16.msra.mxu1 %v977_v10 }
 0x313   :  { %979 = vmatprep.subr.bf16.mxu1 %v1179_v3 }
 0x316   :  { %981 = vmatpush3.bf16.msra.mxu1 %v980_v12 }
 0x317   :  { %982 = vmatprep.subr.bf16.mxu1 %v1179_v3 }
 0x31a   :  { %984 = vmatpush3.bf16.msra.mxu1 %v983_v15 }
 0x31b   :  { %985 = vmatprep.subr.bf16.mxu1 %v1179_v3 }
 0x31e   :  { %987 = vmatpush3.bf16.msra.mxu1 %v986_v18 }
 0x31f   :  { %988 = vmatprep.subr.bf16.mxu1 %v1179_v3 }
 0x322   :  { %990 = vmatpush3.bf16.msra.mxu1 %v989_v24 }
 0x323   :  { %991 = vmatprep.subr.bf16.mxu1 %v1179_v3 }
 0x326   :  { %993 = vmatpush3.bf16.msra.mxu1 %v992_v27 }
 0x327   :  { %994 = vmatprep.subr.bf16.mxu1 %v1179_v3 }
 0x32a   :  { %996 = vmatpush3.bf16.msra.mxu1 %v995_v30 }
 0x32b   :  { %997 = vmatprep.subr.bf16.mxu1 %v1179_v3 }
 0x32e   :  { %999 = vmatpush3.bf16.msra.mxu1 %v998_v33 }
 0x3e4   :  { %v446_v6 = vpop.f32.mrb[2].mxu1 }
 0x3e5   :  { %v450_v19 = vsub.f32 %v363_v5, %v446_v6  ;;  %v821_v20 = vpop.f32.mrb[3].mxu1 }
 0x3e7   :  { %v451_v21 = vmul.f32 %v450_v19, %v450_v19 }
 0x3e9   :  { %855 = vmatmul.mubr.f32.vlgmr.msra.gmra.mrb[4].mxu0 %v451_v21 }
 0x4bc   :  { %v518_v34 = vpop.f32.mrb[4].mxu0 }
 0x4bd   :  { %v519_v35 = vadd.f32 1e-05, %v518_v34  ;;  %v856_v36 = vpop.f32.mrb[5].mxu0 }
 0x4bf   :  { %1015 = vrsqrt.f32 %v519_v35 }
 0x4c9   :  { %v1016_v37 = vpop.eup %1015 }
 0x4ca   :  { %v523_v38 = vmul.f32 %v1016_v37, %v450_v19 }
 0x4cc   :  { %890 = vmatmul.mubr.f32.vlgmr.msra.gmra.mrb[4].mxu1 %v523_v38 }
 0x59f   :  { %v613_v40 = vpop.f32.mrb[4].mxu1 }
 0x5a0   :  { %v614_v41 = vadd.f32 %v651_v39, %v613_v40  ;;  %v891_v42 = vpop.f32.mrb[5].mxu1 }
 0x5a2   :  { %v618_v44 = vmin.f32 %v614_v41, 0.0  ;;  %v617_v3 = vmax.f32 %v614_v41, 0.0 }
 0x5a4   :  { %v620_v47 = vmul.f32 %v619_v43, %v618_v44 }
 0x5a6   :  { %v621_v48 = vadd.f32 %v620_v47, %v617_v3 }
 0x5a8   :  { %v626_v50 = vadd.f32 %v625_v49, %v621_v48 }
 0x5aa   :  { %627 = vst [vmem:[#allocation13] sm:$0x3] %v626_v50 }
 0x5ab   :  { %1150 = shalt.err (!%p1147_p7)
}
 0x5ac   :  { %s1151_s0 = scalar_lea.hbm %s1387_s8, 32 }
 0x5ad   :  { %p1152_p8 = scmp.ne.s32.totalorder %s1387_s8, %s1151_s0  ;;  %p1155_p9 = scmp.lt.u32.totalorder %s1151_s0, %s1387_s8 }
 0x5af   :  { %p1157_p10 = pnand %p1155_p9, %p1152_p8 }
 0x5b1   :  { %1160 = shalt.err (!%p1157_p10)
}
 0x5b2   :  { %637 = dma.vmem_to_hbm [thread:$0]  %s635_s1, 32, %s1387_s8, [#allocation4]  }
 0x5b3   :  { %1169 = dma.done.wait [#allocation4], 32  }
 0x5b4   :  { %1170 = vsyncadd [#allocation4], 4294967264 }
 0x5b5   :  { %641 = vsyncpa [#allocation3], 1 }
 0x5b6   :  { %642 = vsyncpa [#allocation7], 1 }
 0x5b7   :  { %643 = vsyncpa [#allocation10], 1 }
 0x5b8   :  { %644 = vsyncpa [#allocation4], 1 }
 0x5b9   :  { %645 = vsyncpa [#allocation5], 1 }

</bundles_post_ra>
